<compile_context>
chip_gen: v7x
topology: tpu7x:2x2x1
jax: 0.10.0
libtpu: 0.0.40
codegen_flags: <defaults>
</compile_context>

<pallas_src>
import jax
import jax.numpy as jnp
from jax.experimental import pallas as pl
from jax.experimental.pallas import tpu as pltpu


def critic_kernel(x_ref, w1_ref, b1_ref, w2_ref, b2_ref, w3t_ref, b3_ref, out_ref):
    # In-kernel cast of the streaming input to the MXU compute dtype (bf16).
    x = x_ref[...].astype(w1_ref.dtype)

    # fc1 + ReLU (MXU matmul, f32 accumulation)
    h1 = jnp.dot(x, w1_ref[...], preferred_element_type=jnp.float32)
    h1 = jnp.maximum(h1 + b1_ref[...], 0.0)

    # fc2 + ReLU (cast activation back to bf16 to stay on the fast MXU path)
    h2 = jnp.dot(h1.astype(w2_ref.dtype), w2_ref[...],
                 preferred_element_type=jnp.float32)
    h2 = jnp.maximum(h2 + b2_ref[...], 0.0)

    # fc3 value head. w3t_ref is (A, fc2) f32 rows of the output projection.
    A = w3t_ref.shape[0]
    if A == 1:
        # N=1 matvec -> VPU multiply + XLU lane reduce in f32 (avoids a
        # degenerate lane-width-1 MXU matmul and any per-step dtype cast).
        out = jnp.sum(h2 * w3t_ref[...], axis=-1, keepdims=True)   # (TB, 1)
    else:
        out = jax.lax.dot_general(
            h2, w3t_ref[...],
            dimension_numbers=(((1,), (1,)), ((), ())),
            preferred_element_type=jnp.float32)                    # (TB, A)

    out_ref[...] = (out + b3_ref[...]).astype(out_ref.dtype)


def _pick_batch_tile(B, block_b):
    """Pick a sublane-aligned batch tile; prefer >= 2 grid steps (v7x megacore)."""
    if B > block_b:
        return block_b                      # grid already has >= 2 steps
    # Single-tile regime: try to split the batch across 2 TensorCores while
    # keeping the tile a multiple of 8 (sublane) -- otherwise use the full batch.
    half = -(-B // 2)                       # cdiv(B, 2)
    half = -(-half // 8) * 8                # round up to a multiple of 8
    if half < B:
        return half
    return B


def critic_forward(x, params, *, block_b=2048, compute_dtype=jnp.bfloat16):
    """x: (B, state_dim). params: (in,out) weights + (1,out) biases (float32)."""
    w1, b1, w2, b2, w3, b3 = (
        params["w1"], params["b1"], params["w2"],
        params["b2"], params["w3"], params["b3"],
    )
    B, S = x.shape
    F1 = w1.shape[1]
    F2 = w2.shape[1]
    A = w3.shape[1]

    TB = _pick_batch_tile(B, block_b)
    grid = (pl.cdiv(B, TB),)

    # Only the weight matrices are pre-cast to bf16 (they are DMA'd once and
    # stay VMEM-resident). x stays f32 and is cast inside the kernel.
    xf = x.astype(jnp.float32)
    w1c = w1.astype(compute_dtype)
    w2c = w2.astype(compute_dtype)
    w3t = jnp.transpose(w3).astype(jnp.float32)      # (A, fc2) row layout, f32
    b1f = b1.astype(jnp.float32)
    b2f = b2.astype(jnp.float32)
    b3f = b3.astype(jnp.float32)

    # Weights/biases: constant index_map -> DMA'd once, resident across the grid.
    pinned = lambda shape: pl.BlockSpec(shape, lambda i: (0,) * len(shape))

    # Advisory cost hint so XLA can schedule/overlap this small kernel.
    flops = 2 * B * (S * F1 + F1 * F2 + F2 * A)
    bytes_accessed = (
        B * S * 4                                    # x (f32 in)
        + (S * F1 + F1 * F2) * 2                     # bf16 weights
        + F2 * A * 4                                 # f32 w3
        + (F1 + F2 + A) * 4                          # biases
        + B * A * 4                                  # output
    )
    cost = pl.CostEstimate(flops=flops, transcendentals=0,
                           bytes_accessed=bytes_accessed)

    return pl.pallas_call(
        critic_kernel,
        out_shape=jax.ShapeDtypeStruct((B, A), jnp.float32),
        grid=grid,
        in_specs=[
            pl.BlockSpec((TB, S), lambda i: (i, 0)),   # x: tiled over batch
            pinned(w1c.shape), pinned(b1f.shape),
            pinned(w2c.shape), pinned(b2f.shape),
            pinned(w3t.shape), pinned(b3f.shape),
        ],
        out_specs=pl.BlockSpec((TB, A), lambda i: (i, 0)),
        compiler_params=pltpu.CompilerParams(
            dimension_semantics=("parallel",),
        ),
        cost_estimate=cost,
    )(xf, w1c, b1f, w2c, b2f, w3t, b3f)


def orthogonal_weight(key, out_features, in_features, gain):
    # Orthogonal init (matches torch.nn.init.orthogonal_ semantics: QR of a
    # gaussian, sign-corrected, scaled by gain). Stored transposed as (in, out).
    w = jax.nn.initializers.orthogonal(scale=gain, column_axis=-1)(
        key, (out_features, in_features), jnp.float32
    )
    return jnp.transpose(w)  # (in_features, out_features)


def init_critic_params(seed, state_dim, action_space=1, fc1_unit=256, fc2_unit=256,
                       init_weight_gain=float(jnp.sqrt(2.0)),
                       init_value_weight_gain=1.0, init_bias=0.0):
    k1, k2, k3 = jax.random.split(jax.random.PRNGKey(seed), 3)
    return {
        "w1": orthogonal_weight(k1, fc1_unit, state_dim, init_weight_gain),
        "b1": jnp.full((1, fc1_unit), init_bias, jnp.float32),
        "w2": orthogonal_weight(k2, fc2_unit, fc1_unit, init_weight_gain),
        "b2": jnp.full((1, fc2_unit), init_bias, jnp.float32),
        "w3": orthogonal_weight(k3, action_space, fc2_unit, init_value_weight_gain),
        "b3": jnp.full((1, action_space), init_bias, jnp.float32),
    }


def critic_reference(x, p, dtype=jnp.float32):
    """Pure-JAX reference; `dtype` mirrors the kernel's compute dtype."""
    xd = x.astype(dtype)
    w1 = p["w1"].astype(dtype)
    w2 = p["w2"].astype(dtype)
    h1 = jax.nn.relu(jnp.dot(xd, w1, preferred_element_type=jnp.float32) + p["b1"])
    h2 = jax.nn.relu(jnp.dot(h1.astype(dtype), w2,
                             preferred_element_type=jnp.float32) + p["b2"])
    # fc3 stays f32 in the kernel as well.
    return jnp.dot(h2, p["w3"], preferred_element_type=jnp.float32) + p["b3"]


if __name__ == "__main__":
    batch = 8
    state_dim = 32
    action_space = 1

    key = jax.random.PRNGKey(0)
    x = jax.random.normal(key, (batch, state_dim), jnp.float32)

    params = init_critic_params(seed=0, state_dim=state_dim, action_space=action_space)

    out = jax.jit(critic_forward)(x, params)
    out = jax.block_until_ready(out)

    assert out.shape == (batch, action_space), out.shape

    # Tight check against a reference using the same bf16 compute dtype.
    ref_bf16 = critic_reference(x, params, dtype=jnp.bfloat16)
    assert jnp.allclose(out, ref_bf16, atol=1e-2, rtol=1e-2), (out, ref_bf16)

    # Loose check against the full-f32 reference (bf16 matmuls -> ~1e-2 deviation).
    ref_f32 = critic_reference(x, params, dtype=jnp.float32)
    assert jnp.allclose(out, ref_f32, atol=1e-1, rtol=1e-1), (out, ref_f32)

    # Exercise a multi-step grid (partial last tile + megacore split path).
    x_big = jax.random.normal(jax.random.PRNGKey(1), (300, state_dim), jnp.float32)
    out_big = jax.block_until_ready(jax.jit(critic_forward)(x_big, params))
    ref_big = critic_reference(x_big, params, dtype=jnp.bfloat16)
    assert out_big.shape == (300, action_space)
    assert jnp.allclose(out_big, ref_big, atol=1e-2, rtol=1e-2)

    print("KERNEL_OK")
</pallas_src>

<mosaic_0001>
module attributes {stable_mosaic.version = 11 : i64} {
  func.func @critic_kernel(%arg0: i32, %arg1: memref<8x32xf32, #tpu.memory_space<vmem>>, %arg2: memref<32x256xbf16, #tpu.memory_space<vmem>>, %arg3: memref<1x256xf32, #tpu.memory_space<vmem>>, %arg4: memref<256x256xbf16, #tpu.memory_space<vmem>>, %arg5: memref<1x256xf32, #tpu.memory_space<vmem>>, %arg6: memref<1x256xf32, #tpu.memory_space<vmem>>, %arg7: memref<1x1xf32, #tpu.memory_space<vmem>>, %arg8: memref<8x1xf32, #tpu.memory_space<vmem>>) attributes {dimension_semantics = [#tpu.dimension_semantics<parallel>], iteration_bounds = array<i64: 1>, scalar_prefetch = 0 : i64, scratch_operands = 0 : i64, tpu.core_type = #tpu.core_type<tc>, window_params = [{transform_indices = @transform_0, window_bounds = array<i64: 8, 32>}, {pipeline_mode = #tpu.pipeline_mode<synchronous>, transform_indices = @transform_1, window_bounds = array<i64: 32, 256>}, {pipeline_mode = #tpu.pipeline_mode<synchronous>, transform_indices = @transform_2, window_bounds = array<i64: 1, 256>}, {pipeline_mode = #tpu.pipeline_mode<synchronous>, transform_indices = @transform_3, window_bounds = array<i64: 256, 256>}, {pipeline_mode = #tpu.pipeline_mode<synchronous>, transform_indices = @transform_4, window_bounds = array<i64: 1, 256>}, {pipeline_mode = #tpu.pipeline_mode<synchronous>, transform_indices = @transform_5, window_bounds = array<i64: 1, 256>}, {pipeline_mode = #tpu.pipeline_mode<synchronous>, transform_indices = @transform_6, window_bounds = array<i64: 1, 1>}, {transform_indices = @transform_7, window_bounds = array<i64: 8, 1>}]} {
    %c0 = arith.constant 0 : index
    %c0_0 = arith.constant 0 : index
    %0 = vector.load %arg1[%c0, %c0_0] : memref<8x32xf32, #tpu.memory_space<vmem>>, vector<8x32xf32>
    %1 = arith.truncf %0 : vector<8x32xf32> to vector<8x32xbf16>
    %c0_1 = arith.constant 0 : index
    %c0_2 = arith.constant 0 : index
    %2 = vector.load %arg2[%c0_1, %c0_2] : memref<32x256xbf16, #tpu.memory_space<vmem>>, vector<32x256xbf16>
    %cst = arith.constant dense<0.000000e+00> : vector<8x256xf32>
    %3 = tpu.matmul %1, %2, %cst {dimension_numbers = #tpu.dot_dimension_numbers<[1], [0], [0], [1], [0, 0, 1, 1], [], []>} : vector<8x32xbf16>, vector<32x256xbf16>, vector<8x256xf32> -> vector<8x256xf32>
    %c0_3 = arith.constant 0 : index
    %c0_4 = arith.constant 0 : index
    %4 = vector.load %arg3[%c0_3, %c0_4] : memref<1x256xf32, #tpu.memory_space<vmem>>, vector<1x256xf32>
    %5 = vector.broadcast %4 : vector<1x256xf32> to vector<8x256xf32>
    %6 = arith.addf %3, %5 : vector<8x256xf32>
    %cst_5 = arith.constant 0.000000e+00 : f32
    %7 = vector.broadcast %cst_5 : f32 to vector<8x256xf32>
    %8 = arith.maximumf %6, %7 : vector<8x256xf32>
    %9 = arith.truncf %8 : vector<8x256xf32> to vector<8x256xbf16>
    %c0_6 = arith.constant 0 : index
    %c0_7 = arith.constant 0 : index
    %10 = vector.load %arg4[%c0_6, %c0_7] : memref<256x256xbf16, #tpu.memory_space<vmem>>, vector<256x256xbf16>
    %cst_8 = arith.constant dense<0.000000e+00> : vector<8x256xf32>
    %11 = tpu.matmul %9, %10, %cst_8 {dimension_numbers = #tpu.dot_dimension_numbers<[1], [0], [0], [1], [0, 0, 1, 1], [], []>} : vector<8x256xbf16>, vector<256x256xbf16>, vector<8x256xf32> -> vector<8x256xf32>
    %c0_9 = arith.constant 0 : index
    %c0_10 = arith.constant 0 : index
    %12 = vector.load %arg5[%c0_9, %c0_10] : memref<1x256xf32, #tpu.memory_space<vmem>>, vector<1x256xf32>
    %13 = vector.broadcast %12 : vector<1x256xf32> to vector<8x256xf32>
    %14 = arith.addf %11, %13 : vector<8x256xf32>
    %cst_11 = arith.constant 0.000000e+00 : f32
    %15 = vector.broadcast %cst_11 : f32 to vector<8x256xf32>
    %16 = arith.maximumf %14, %15 : vector<8x256xf32>
    %c0_12 = arith.constant 0 : index
    %c0_13 = arith.constant 0 : index
    %17 = vector.load %arg6[%c0_12, %c0_13] : memref<1x256xf32, #tpu.memory_space<vmem>>, vector<1x256xf32>
    %18 = vector.broadcast %17 : vector<1x256xf32> to vector<8x256xf32>
    %19 = arith.mulf %16, %18 : vector<8x256xf32>
    %cst_14 = arith.constant dense<0.000000e+00> : vector<8xf32>
    %20 = vector.multi_reduction <add>, %19, %cst_14 [1] : vector<8x256xf32> to vector<8xf32>
    %21 = vector.shape_cast %20 : vector<8xf32> to vector<8x1xf32>
    %c0_15 = arith.constant 0 : index
    %c0_16 = arith.constant 0 : index
    %22 = vector.load %arg7[%c0_15, %c0_16] : memref<1x1xf32, #tpu.memory_space<vmem>>, vector<1x1xf32>
    %23 = vector.broadcast %22 : vector<1x1xf32> to vector<8x1xf32>
    %24 = arith.addf %21, %23 : vector<8x1xf32>
    %c0_17 = arith.constant 0 : index
    %c0_18 = arith.constant 0 : index
    %25 = vector.load %arg8[%c0_17, %c0_18] : memref<8x1xf32, #tpu.memory_space<vmem>>, vector<8x1xf32>
    tpu.vector_store %arg8[%c0_17, %c0_18], %24 {strides = array<i32>} : memref<8x1xf32, #tpu.memory_space<vmem>>, vector<8x1xf32>,
    return
  }
  func.func @transform_0(%arg0: i32) -> (i32, i32) {
    %c0_i32 = arith.constant 0 : i32
    %c0_i32_0 = arith.constant 0 : i32
    return %arg0, %c0_i32 : i32, i32
  }
  func.func @transform_1(%arg0: i32) -> (i32, i32) {
    %c0_i32 = arith.constant 0 : i32
    %c0_i32_0 = arith.constant 0 : i32
    %c0_i32_1 = arith.constant 0 : i32
    return %c0_i32, %c0_i32_0 : i32, i32
  }
  func.func @transform_2(%arg0: i32) -> (i32, i32) {
    %c0_i32 = arith.constant 0 : i32
    %c0_i32_0 = arith.constant 0 : i32
    %c0_i32_1 = arith.constant 0 : i32
    return %c0_i32, %c0_i32_0 : i32, i32
  }
  func.func @transform_3(%arg0: i32) -> (i32, i32) {
    %c0_i32 = arith.constant 0 : i32
    %c0_i32_0 = arith.constant 0 : i32
    %c0_i32_1 = arith.constant 0 : i32
    return %c0_i32, %c0_i32_0 : i32, i32
  }
  func.func @transform_4(%arg0: i32) -> (i32, i32) {
    %c0_i32 = arith.constant 0 : i32
    %c0_i32_0 = arith.constant 0 : i32
    %c0_i32_1 = arith.constant 0 : i32
    return %c0_i32, %c0_i32_0 : i32, i32
  }
  func.func @transform_5(%arg0: i32) -> (i32, i32) {
    %c0_i32 = arith.constant 0 : i32
    %c0_i32_0 = arith.constant 0 : i32
    %c0_i32_1 = arith.constant 0 : i32
    return %c0_i32, %c0_i32_0 : i32, i32
  }
  func.func @transform_6(%arg0: i32) -> (i32, i32) {
    %c0_i32 = arith.constant 0 : i32
    %c0_i32_0 = arith.constant 0 : i32
    %c0_i32_1 = arith.constant 0 : i32
    return %c0_i32, %c0_i32_0 : i32, i32
  }
  func.func @transform_7(%arg0: i32) -> (i32, i32) {
    %c0_i32 = arith.constant 0 : i32
    %c0_i32_0 = arith.constant 0 : i32
    return %arg0, %c0_i32 : i32, i32
  }
}

</mosaic_0001>

<bundles_post_ra>
// kernel: critic_forward.1
= control target key start
LH: loop header
LB: loop body
LE: loop exit
PB: predicated region body
PF: predicated region fallthrough
CT: control target
= control target key end

     0   :  { %v487_v1 = vmov 0   ;;  %vm67_vm0 = vcmask 261120   ;;  %v37_v39 = vlaneseq  ;;  %vm388_vm1 = vcmask 7168   ;;  %s654_s1 = inlined_call_operand.vmem [shape: bf16[32,256], index: 1, kind: input, shape index: {}]   ;;  %s655_s0 = inlined_call_operand.vmem [shape: f32[8,32], index: 0, kind: input, shape index: {}]   ;;  %s656_s3 = inlined_call_operand.vmem [shape: bf16[256,256], index: 3, kind: input, shape index: {}]   ;;  %s657_s2 = inlined_call_operand.vmem [shape: f32[1,256], index: 2, kind: input, shape index: {}]   ;;  %s658_s6 = inlined_call_operand.<no memory space> [shape: f32[1,1], index: 6, kind: input, shape index: {}]   ;;  %s659_s4 = inlined_call_operand.vmem [shape: f32[1,256], index: 4, kind: input, shape index: {}]   ;;  %s660_s5 = inlined_call_operand.vmem [shape: f32[1,256], index: 5, kind: input, shape index: {}]   ;;  %s661_s7 = inlined_call_operand.vmem [shape: f32[8,1], index: 7, kind: output, shape index: {}]  }
   0x1   :  { %v433_v0 = vld [vmem:[%s654_s1 + $0x4] ss:$8 sps:$4 sm:$0xff]   ;;  %103 = vmatprep.mubr.bf16.mxu0 %v487_v1  ;;  %v435_v2 = vld [vmem:[%s654_s1] ss:$8 sps:$4 sm:$0xff]   ;;  %v436_v3 = vld [vmem:[%s654_s1 + $0x14] ss:$8 sps:$4 sm:$0xff]   ;;  %v12_v56 = vstv %s658_s6 }
   0x2   :  { %71 = vmatprep.subr.bf16.mxu0 %v433_v0  ;;  %v438_v4 = vld [vmem:[%s654_s1 + $0x10] ss:$8 sps:$4 sm:$0xff]   ;;  %v29_v5 = vld [vmem:[%s655_s0] sm:$0xff]  ;;  %v442_v8 = vld [vmem:[%s656_s3 + $0x14] ss:$8 sps:$4 sm:$0xff]   ;;  %v38_v40 = vshrl.u32 %v37_v39, 7 }
   0x3   :  { %72 = vmatpush1.bf16.msra.mxu0 %v435_v2  ;;  %v439_v6 = vld [vmem:[%s656_s3 + $0x4] ss:$8 sps:$4 sm:$0xff]   ;;  %v441_v7 = vld [vmem:[%s656_s3] ss:$8 sps:$4 sm:$0xff]   ;;  %v30_v9 = vpack.c.bf16 %v29_v5, %v29_v5  ;;  %v444_v10 = vld [vmem:[%s656_s3 + $0x10] ss:$8 sps:$4 sm:$0xff]  }
   0x4   :  { %73 = vmatprep.subr.bf16.mxu0 %v436_v3  ;;  %320 = vmatprep.subr.bf16.mxu1 %v439_v6  ;;  %v445_v11 = vld [vmem:[%s656_s3 + $0x24] ss:$8 sps:$4 sm:$0xff]   ;;  %v447_v12 = vld [vmem:[%s656_s3 + $0x20] ss:$8 sps:$4 sm:$0xff]   ;;  %v448_v13 = vld [vmem:[%s656_s3 + $0x34] ss:$8 sps:$4 sm:$0xff]  }
   0x5   :  { %321 = vmatpush1.bf16.msra.mxu1 %v441_v7  ;;  %v450_v14 = vld [vmem:[%s656_s3 + $0x30] ss:$8 sps:$4 sm:$0xff]   ;;  %v451_v15 = vld [vmem:[%s656_s3 + $0x44] ss:$8 sps:$4 sm:$0xff]   ;;  %v453_v16 = vld [vmem:[%s656_s3 + $0x40] ss:$8 sps:$4 sm:$0xff]  }
   0x6   :  { %322 = vmatprep.subr.bf16.mxu1 %v442_v8  ;;  %v454_v17 = vld [vmem:[%s656_s3 + $0x54] ss:$8 sps:$4 sm:$0xff]   ;;  %v456_v18 = vld [vmem:[%s656_s3 + $0x50] ss:$8 sps:$4 sm:$0xff]   ;;  %v457_v19 = vld [vmem:[%s656_s3 + $0x64] ss:$8 sps:$4 sm:$0xff]  }
   0x7   :  { %74 = vmatpush1.bf16.msra.mxu0 %v438_v4  ;;  %v459_v20 = vld [vmem:[%s656_s3 + $0x60] ss:$8 sps:$4 sm:$0xff]   ;;  %v460_v21 = vld [vmem:[%s656_s3 + $0x74] ss:$8 sps:$4 sm:$0xff]   ;;  %v462_v22 = vld [vmem:[%s656_s3 + $0x70] ss:$8 sps:$4 sm:$0xff]  }
   0x8   :  { %v463_v23 = vld [vmem:[%s656_s3 + $0x84] ss:$8 sps:$4 sm:$0xff]   ;;  %v465_v24 = vld [vmem:[%s656_s3 + $0x80] ss:$8 sps:$4 sm:$0xff]   ;;  %v466_v25 = vld [vmem:[%s656_s3 + $0x94] ss:$8 sps:$4 sm:$0xff]  }
   0x9   :  { %323 = vmatpush1.bf16.msra.mxu1 %v444_v10  ;;  %v468_v26 = vld [vmem:[%s656_s3 + $0x90] ss:$8 sps:$4 sm:$0xff]   ;;  %v469_v27 = vld [vmem:[%s656_s3 + $0xa4] ss:$8 sps:$4 sm:$0xff]   ;;  %v471_v28 = vld [vmem:[%s656_s3 + $0xa0] ss:$8 sps:$4 sm:$0xff]  }
   0xa   :  { %398 = vmatmul.mubr.msk.bf16.vlgmr.msra.gmra.mrb[0].mxu0 %vm67_vm0, %v30_v9  ;;  %324 = vmatprep.subr.bf16.mxu1 %v445_v11  ;;  %v472_v29 = vld [vmem:[%s656_s3 + $0xb4] ss:$8 sps:$4 sm:$0xff]   ;;  %v474_v30 = vld [vmem:[%s656_s3 + $0xb0] ss:$8 sps:$4 sm:$0xff]   ;;  %v475_v31 = vld [vmem:[%s656_s3 + $0xc4] ss:$8 sps:$4 sm:$0xff]  }
   0xb   :  { %v477_v32 = vld [vmem:[%s656_s3 + $0xc0] ss:$8 sps:$4 sm:$0xff]   ;;  %v478_v33 = vld [vmem:[%s656_s3 + $0xd4] ss:$8 sps:$4 sm:$0xff]   ;;  %v480_v34 = vld [vmem:[%s656_s3 + $0xd0] ss:$8 sps:$4 sm:$0xff]  }
   0xc   :  { %v481_v35 = vld [vmem:[%s656_s3 + $0xe4] ss:$8 sps:$4 sm:$0xff]   ;;  %v483_v36 = vld [vmem:[%s656_s3 + $0xe0] ss:$8 sps:$4 sm:$0xff]   ;;  %v484_v37 = vld [vmem:[%s656_s3 + $0xf4] ss:$8 sps:$4 sm:$0xff]  }
   0xd   :  { %325 = vmatpush1.bf16.msra.mxu1 %v447_v12  ;;  %v486_v38 = vld [vmem:[%s656_s3 + $0xf0] ss:$8 sps:$4 sm:$0xff]   ;;  %v39_v41 = vsub.s32 0, %v38_v40  ;;  %v35_v42 = vld [vmem:[%s657_s2] sm:$0x3]  ;;  %v43_v43 = vsub.s32 1, %v38_v40 }
   0xe   :  { %326 = vmatprep.subr.bf16.mxu1 %v448_v13  ;;  %13 = vst [vmem:[#allocation2] sm:$0x1] %v12_v56  ;;  %v148_v57 = vld [vmem:[%s659_s4] sm:$0x3] }
   0xf   :  { %v40_v44 = vrot.slane %v35_v42, %v39_v41  ;;  %v44_v45 = vrot.slane %v35_v42, %v43_v43  ;;  %v153_v58 = vrot.slane %v148_v57, %v39_v41  ;;  %v157_v59 = vrot.slane %v148_v57, %v43_v43  ;;  %v363_v60 = vld [vmem:[%s660_s5] sm:$0x3] }
  0x10   :  { %v368_v0 = vrot.slane %v363_v60, %v39_v41  ;;  %v372_v3 = vrot.slane %v363_v60, %v43_v43 }
  0x11   :  { %327 = vmatpush1.bf16.msra.mxu1 %v450_v14 }
  0x12   :  { %328 = vmatprep.subr.bf16.mxu1 %v451_v15 }
  0x15   :  { %329 = vmatpush1.bf16.msra.mxu1 %v453_v16  ;;  %v431_v10 = vld [vmem:[#allocation2] ss:$0 sm:$0xff] }
  0x16   :  { %330 = vmatprep.subr.bf16.mxu1 %v454_v17 }
  0x19   :  { %331 = vmatpush1.bf16.msra.mxu1 %v456_v18 }
  0x1a   :  { %332 = vmatprep.subr.bf16.mxu1 %v457_v19 }
  0x1d   :  { %333 = vmatpush1.bf16.msra.mxu1 %v459_v20 }
  0x1e   :  { %334 = vmatprep.subr.bf16.mxu1 %v460_v21 }
  0x21   :  { %335 = vmatpush1.bf16.msra.mxu1 %v462_v22 }
  0x22   :  { %336 = vmatprep.subr.bf16.mxu1 %v463_v23 }
  0x25   :  { %337 = vmatpush1.bf16.msra.mxu1 %v465_v24 }
  0x26   :  { %338 = vmatprep.subr.bf16.mxu1 %v466_v25 }
  0x29   :  { %339 = vmatpush1.bf16.msra.mxu1 %v468_v26 }
  0x2a   :  { %340 = vmatprep.subr.bf16.mxu1 %v469_v27 }
  0x2d   :  { %341 = vmatpush1.bf16.msra.mxu1 %v471_v28 }
  0x2e   :  { %342 = vmatprep.subr.bf16.mxu1 %v472_v29 }
  0x31   :  { %343 = vmatpush1.bf16.msra.mxu1 %v474_v30 }
  0x32   :  { %344 = vmatprep.subr.bf16.mxu1 %v475_v31 }
  0x35   :  { %345 = vmatpush1.bf16.msra.mxu1 %v477_v32 }
  0x36   :  { %346 = vmatprep.subr.bf16.mxu1 %v478_v33 }
  0x39   :  { %347 = vmatpush1.bf16.msra.mxu1 %v480_v34 }
  0x3a   :  { %348 = vmatprep.subr.bf16.mxu1 %v481_v35 }
  0x3d   :  { %349 = vmatpush1.bf16.msra.mxu1 %v483_v36 }
  0x3e   :  { %350 = vmatprep.subr.bf16.mxu1 %v484_v37 }
  0x41   :  { %351 = vmatpush1.bf16.msra.mxu1 %v486_v38 }
  0xdd   :  { %v105_v46 = vpop.f32.mrb[0].mxu0 }
  0xde   :  { %v106_v47 = vadd.f32 %v105_v46, %v40_v44  ;;  %v107_v48 = vpop.f32.mrb[1].mxu0 }
  0xdf   :  { %v108_v49 = vadd.f32 %v107_v48, %v44_v45  ;;  %v109_v50 = vpop.f32.mrb[2].mxu0 }
  0xe0   :  { %v112_v51 = vmax.f32 %v106_v47, 0.0  ;;  %v110_v52 = vpop.f32.mrb[3].mxu0 }
  0xe1   :  { %v113_v53 = vmax.f32 %v108_v49, 0.0 }
  0xe2   :  { %v114_v55 = vpack.c.bf16 %v112_v51, %v112_v51 }
  0xe3   :  { %v115_v54 = vpack.c.bf16 %v113_v53, %v113_v53 }
  0xe5   :  { %352 = vmatprep.mubr.bf16.mxu1 %v115_v54 }
  0xe6   :  { %353 = vmatmul.mubr.bf16.vlgmr.msra.gmra.mrb[0].mxu1 %v114_v55 }
 0x1b9   :  { %v354_v61 = vpop.f32.mrb[0].mxu1 }
 0x1ba   :  { %v355_v62 = vadd.f32 %v354_v61, %v153_v58  ;;  %v356_v63 = vpop.f32.mrb[1].mxu1 }
 0x1bb   :  { %v357_v1 = vadd.f32 %v356_v63, %v157_v59  ;;  %v358_v2 = vpop.f32.mrb[2].mxu1 }
 0x1bc   :  { %v361_v4 = vmax.f32 %v355_v62, 0.0  ;;  %v359_v5 = vpop.f32.mrb[3].mxu1 }
 0x1bd   :  { %v362_v6 = vmax.f32 %v357_v1, 0.0 }
 0x1be   :  { %v375_v7 = vmul.f32 %v368_v0, %v361_v4 }
 0x1bf   :  { %v376_v8 = vmul.f32 %v372_v3, %v362_v6 }
 0x1c1   :  { %v377_v9 = vadd.f32 %v376_v8, %v375_v7 }
 0x1c3   :  { %378 = vadd.xlane.f32.xlu0 %v377_v9 }
 0x250   :  { %v379_v11 = vpop.xlane.xlu0 %378 }
 0x251   :  { %v387_v12 = vadd.f32 %v431_v10, %v379_v11 }
 0x253   :  { %389 = vst.msk [vmem:[%s661_s7] sm:$0xff] %vm388_vm1, %v387_v12 }

</bundles_post_ra>
